<compile_context>
chip_gen: v5e
topology: v5e:2x2
jax: 0.10.0
libtpu: 0.0.40
codegen_flags: <defaults>
</compile_context>

<pallas_src>
import functools

import jax
import jax.numpy as jnp
from jax.experimental import pallas as pl
from jax.experimental.pallas import tpu as pltpu

_SQRT_2_OVER_PI = 0.7978845608028654


def _round_up(x: int, m: int) -> int:
    return ((x + m - 1) // m) * m


def _gelu_tanh(h):
    # tanh-approximate GELU (matches nn.GELU(approximate='tanh')), in f32.
    return 0.5 * h * (1.0 + jnp.tanh(_SQRT_2_OVER_PI * (h + 0.044715 * (h * h * h))))


def _vmem_capacity_bytes() -> int:
    try:
        return int(pltpu.get_tpu_info().vmem_capacity_bytes)
    except Exception:
        return 64 * 1024 * 1024  # conservative: v7x per-TC VMEM


# --------------------------------------------------------------------------
# Kernel bodies
# --------------------------------------------------------------------------
def _mlp_kernel_resident(x_ref, w1_ref, b1_ref, w2_ref, b2_ref, o_ref):
    # x_ref:  (tm, D)   token tile
    # w1_ref: (D, H)    full fc1 weight (VMEM-resident, fetched once)
    # w2_ref: (H, D)    full fc2 weight (VMEM-resident, fetched once)
    h = jnp.dot(x_ref[...], w1_ref[...], preferred_element_type=jnp.float32)
    h = h + b1_ref[...].astype(jnp.float32)
    g = _gelu_tanh(h)
    y = jnp.dot(g.astype(w2_ref.dtype), w2_ref[...],
                preferred_element_type=jnp.float32)
    o_ref[...] = (y + b2_ref[...].astype(jnp.float32)).astype(o_ref.dtype)


def _mlp_kernel_htiled(x_ref, w1_ref, b1_ref, w2_ref, b2_ref, o_ref, acc_ref):
    # x_ref:  (tm, D)   token tile
    # w1_ref: (D, th)   fc1 weight chunk      b1_ref: (1, th)
    # w2_ref: (th, D)   fc2 weight chunk      b2_ref: (1, D)
    # acc_ref:(tm, D)   f32 accumulator scratch (persists across the H axis)
    k = pl.program_id(1)

    @pl.when(k == 0)
    def _():
        acc_ref[...] = jnp.zeros_like(acc_ref)

    h = jnp.dot(x_ref[...], w1_ref[...], preferred_element_type=jnp.float32)
    h = h + b1_ref[...].astype(jnp.float32)
    g = _gelu_tanh(h)
    acc_ref[...] += jnp.dot(g.astype(w2_ref.dtype), w2_ref[...],
                            preferred_element_type=jnp.float32)

    @pl.when(k == pl.num_programs(1) - 1)
    def _():
        o_ref[...] = (acc_ref[...] + b2_ref[...].astype(jnp.float32)
                      ).astype(o_ref.dtype)


# --------------------------------------------------------------------------
# Wrapper
# --------------------------------------------------------------------------
@functools.partial(
    jax.jit,
    static_argnames=("block_m", "block_h", "compute_dtype", "weights_resident"))
def mlp_forward(hidden_states, w1, b1, w2, b2, *, block_m=512, block_h=1024,
                compute_dtype=None, weights_resident=None):
    """hidden_states: [B, N, D] -> [B, N, D]."""
    B, N, D = hidden_states.shape
    H = w1.shape[1]
    M = B * N
    out_dtype = hidden_states.dtype

    x2d = hidden_states.reshape(M, D)
    b1 = b1.reshape(1, H)
    b2 = b2.reshape(1, D)

    # Optional bf16 fast path for the MXU (f32 accumulation stays in-kernel).
    if compute_dtype is not None:
        x2d = x2d.astype(compute_dtype)
        w1 = w1.astype(compute_dtype)
        w2 = w2.astype(compute_dtype)

    x_it = x2d.dtype.itemsize
    w_it = w1.dtype.itemsize
    o_it = jnp.dtype(out_dtype).itemsize

    # ---- row (token) tile: 128-aligned when M is big, else multiple of 8 ----
    if M >= 128:
        tm = min(_round_up(block_m, 128), _round_up(M, 128))
    else:
        tm = min(_round_up(block_m, 8), _round_up(M, 8))

    vmem_cap = _vmem_capacity_bytes()
    vmem_target = int(0.75 * vmem_cap)  # headroom for compiler scratch / sems

    def _resident_estimate(tm_):
        w_bytes = ((D * H + H) + (H * D + D)) * w_it
        return (2 * w_bytes                 # weights/biases (double-buffered)
                + 2 * tm_ * D * x_it        # x tile
                + 2 * tm_ * D * o_it        # out tile
                + 2 * tm_ * H * 4)          # f32 hidden intermediates

    use_resident = weights_resident
    if use_resident is None:
        tm_try = tm
        while tm_try > 128 and _resident_estimate(tm_try) > vmem_target:
            tm_try = max(128, _round_up(tm_try // 2, 128))
        use_resident = _resident_estimate(tm_try) <= vmem_target
        if use_resident:
            tm = tm_try

    flops = 4 * M * D * H
    trans = M * H

    # ================= Weight-resident path (typical ViT sizes) =============
    if use_resident:
        grid = (pl.cdiv(M, tm),)
        est = _resident_estimate(tm)
        vmem_limit = int(min(vmem_target,
                             max(32 * 1024 * 1024, int(1.25 * est))))
        cost = pl.CostEstimate(
            flops=flops, transcendentals=trans,
            bytes_accessed=(M * D * x_it + M * D * o_it
                            + (D * H + H + H * D + D) * w_it))

        out2d = pl.pallas_call(
            _mlp_kernel_resident,
            out_shape=jax.ShapeDtypeStruct((M, D), out_dtype),
            grid_spec=pltpu.PrefetchScalarGridSpec(
                num_scalar_prefetch=0,
                grid=grid,
                in_specs=[
                    pl.BlockSpec((tm, D), lambda i: (i, 0)),   # x tile
                    pl.BlockSpec((D, H), lambda i: (0, 0)),    # W1 (resident)
                    pl.BlockSpec((1, H), lambda i: (0, 0)),    # b1
                    pl.BlockSpec((H, D), lambda i: (0, 0)),    # W2 (resident)
                    pl.BlockSpec((1, D), lambda i: (0, 0)),    # b2
                ],
                out_specs=pl.BlockSpec((tm, D), lambda i: (i, 0)),
            ),
            compiler_params=pltpu.CompilerParams(
                dimension_semantics=("parallel",),
                vmem_limit_bytes=vmem_limit,
            ),
            cost_estimate=cost,
        )(x2d, w1, b1, w2, b2)
        return out2d.reshape(B, N, D)

    # ================= H-chunked fallback (very large hidden dims) ==========
    # hidden tile: lane-dense multiple of 128 that exactly divides H (padded
    # H-chunks would contaminate the K-reduction, so divisibility is required).
    if H % 128 == 0:
        th = min(_round_up(block_h, 128), H)
        while H % th != 0:
            th -= 128
    else:
        th = H  # small / odd H: whole dim (block == full dim is always legal)

    grid = (pl.cdiv(M, tm), H // th)
    est = (2 * tm * D * x_it                     # x tile
           + 2 * (D * th + th) * w_it            # W1 + b1 chunks
           + 2 * (th * D + D) * w_it             # W2 + b2 chunks
           + 2 * tm * D * o_it                   # out tile
           + tm * D * 4                          # accumulator
           + 2 * tm * th * 4)                    # f32 hidden intermediates
    vmem_limit = int(min(vmem_target, max(32 * 1024 * 1024, int(1.25 * est))))
    cost = pl.CostEstimate(
        flops=flops, transcendentals=trans,
        bytes_accessed=(M * D * x_it + M * D * o_it
                        + grid[0] * (D * H + H + H * D + D) * w_it))

    out2d = pl.pallas_call(
        _mlp_kernel_htiled,
        out_shape=jax.ShapeDtypeStruct((M, D), out_dtype),
        grid_spec=pltpu.PrefetchScalarGridSpec(
            num_scalar_prefetch=0,
            grid=grid,
            in_specs=[
                pl.BlockSpec((tm, D), lambda i, k: (i, 0)),   # x tile
                pl.BlockSpec((D, th), lambda i, k: (0, k)),   # W1 chunk
                pl.BlockSpec((1, th), lambda i, k: (0, k)),   # b1 chunk
                pl.BlockSpec((th, D), lambda i, k: (k, 0)),   # W2 chunk
                pl.BlockSpec((1, D), lambda i, k: (0, 0)),    # b2
            ],
            out_specs=pl.BlockSpec((tm, D), lambda i, k: (i, 0)),
            scratch_shapes=[pltpu.VMEM((tm, D), jnp.float32)],
        ),
        compiler_params=pltpu.CompilerParams(
            dimension_semantics=("parallel", "arbitrary"),
            vmem_limit_bytes=vmem_limit,
        ),
        cost_estimate=cost,
    )(x2d, w1, b1, w2, b2)
    return out2d.reshape(B, N, D)


# --------------------------------------------------------------------------
# Reference + self-test
# --------------------------------------------------------------------------
def _reference(hidden_states, w1, b1, w2, b2):
    x = hidden_states.astype(jnp.float32)
    h = x @ w1.astype(jnp.float32) + b1.reshape(1, 1, -1).astype(jnp.float32)
    g = 0.5 * h * (1.0 + jnp.tanh(_SQRT_2_OVER_PI * (h + 0.044715 * h ** 3)))
    y = g @ w2.astype(jnp.float32) + b2.reshape(1, 1, -1).astype(jnp.float32)
    return y.astype(hidden_states.dtype)


if __name__ == "__main__":
    key = jax.random.PRNGKey(0)

    def make_case(B, N, D, H, k):
        kx, k1, k2, k3, k4 = jax.random.split(k, 5)
        x = jax.random.normal(kx, (B, N, D), dtype=jnp.float32)
        w1 = jax.random.normal(k1, (D, H), dtype=jnp.float32) * (1.0 / D ** 0.5)
        b1 = jax.random.normal(k2, (1, H), dtype=jnp.float32) * 0.02
        w2 = jax.random.normal(k3, (H, D), dtype=jnp.float32) * (1.0 / H ** 0.5)
        b2 = jax.random.normal(k4, (1, D), dtype=jnp.float32) * 0.02
        return x, w1, b1, w2, b2

    kc1, kc2, kc3 = jax.random.split(key, 3)

    # Case 1: toy config (batch=2, patches=8, embed=32, hidden=64),
    # weight-resident fast path.
    x, w1, b1, w2, b2 = make_case(2, 8, 32, 64, kc1)
    out = jax.block_until_ready(mlp_forward(x, w1, b1, w2, b2))
    ref = _reference(x, w1, b1, w2, b2)
    assert out.shape == x.shape
    assert jnp.allclose(out, ref, atol=5e-3, rtol=5e-3), "mismatch (resident)"

    # Case 2: forces the H-chunked accumulator fallback and a ragged last row
    # tile (M=50 with tm=32 -> masked writeback, no jnp.pad round-trip).
    x, w1, b1, w2, b2 = make_case(2, 25, 128, 256, kc2)
    out = jax.block_until_ready(
        mlp_forward(x, w1, b1, w2, b2, block_m=32, block_h=128,
                    weights_resident=False))
    ref = _reference(x, w1, b1, w2, b2)
    assert out.shape == x.shape
    assert jnp.allclose(out, ref, atol=2e-2, rtol=2e-2), "mismatch (H-tiled)"

    # Case 3: bf16 operands on the MXU (f32 accumulation), resident path.
    x, w1, b1, w2, b2 = make_case(2, 32, 256, 512, kc3)
    out = jax.block_until_ready(
        mlp_forward(x, w1, b1, w2, b2, compute_dtype=jnp.bfloat16))
    ref = _reference(x, w1, b1, w2, b2)
    assert out.shape == x.shape
    assert jnp.allclose(out, ref, atol=3e-2, rtol=3e-2), "mismatch (bf16)"

    print("KERNEL_OK")
</pallas_src>

<mosaic_0001>
module attributes {stable_mosaic.version = 11 : i64} {
  func.func @_mlp_kernel_resident(%arg0: i32, %arg1: memref<16x32xf32, #tpu.memory_space<vmem>>, %arg2: memref<32x64xf32, #tpu.memory_space<vmem>>, %arg3: memref<1x64xf32, #tpu.memory_space<vmem>>, %arg4: memref<64x32xf32, #tpu.memory_space<vmem>>, %arg5: memref<1x32xf32, #tpu.memory_space<vmem>>, %arg6: memref<16x32xf32, #tpu.memory_space<vmem>>) attributes {dimension_semantics = [#tpu.dimension_semantics<parallel>], iteration_bounds = array<i64: 1>, scalar_prefetch = 0 : i64, scratch_operands = 0 : i64, tpu.core_type = #tpu.core_type<tc>, window_params = [{transform_indices = @transform_0, window_bounds = array<i64: 16, 32>}, {pipeline_mode = #tpu.pipeline_mode<synchronous>, transform_indices = @transform_1, window_bounds = array<i64: 32, 64>}, {pipeline_mode = #tpu.pipeline_mode<synchronous>, transform_indices = @transform_2, window_bounds = array<i64: 1, 64>}, {pipeline_mode = #tpu.pipeline_mode<synchronous>, transform_indices = @transform_3, window_bounds = array<i64: 64, 32>}, {pipeline_mode = #tpu.pipeline_mode<synchronous>, transform_indices = @transform_4, window_bounds = array<i64: 1, 32>}, {transform_indices = @transform_5, window_bounds = array<i64: 16, 32>}]} {
    %c0 = arith.constant 0 : index
    %c0_0 = arith.constant 0 : index
    %0 = vector.load %arg1[%c0, %c0_0] : memref<16x32xf32, #tpu.memory_space<vmem>>, vector<16x32xf32>
    %c0_1 = arith.constant 0 : index
    %c0_2 = arith.constant 0 : index
    %1 = vector.load %arg2[%c0_1, %c0_2] : memref<32x64xf32, #tpu.memory_space<vmem>>, vector<32x64xf32>
    %cst = arith.constant dense<0.000000e+00> : vector<16x64xf32>
    %2 = tpu.matmul %0, %1, %cst {dimension_numbers = #tpu.dot_dimension_numbers<[1], [0], [0], [1], [0, 0, 1, 1], [], []>} : vector<16x32xf32>, vector<32x64xf32>, vector<16x64xf32> -> vector<16x64xf32>
    %c0_3 = arith.constant 0 : index
    %c0_4 = arith.constant 0 : index
    %3 = vector.load %arg3[%c0_3, %c0_4] : memref<1x64xf32, #tpu.memory_space<vmem>>, vector<1x64xf32>
    %4 = vector.broadcast %3 : vector<1x64xf32> to vector<16x64xf32>
    %5 = arith.addf %2, %4 : vector<16x64xf32>
    %cst_5 = arith.constant 5.000000e-01 : f32
    %6 = vector.broadcast %cst_5 : f32 to vector<16x64xf32>
    %7 = arith.mulf %6, %5 : vector<16x64xf32>
    %8 = arith.mulf %5, %5 : vector<16x64xf32>
    %9 = arith.mulf %8, %5 : vector<16x64xf32>
    %cst_6 = arith.constant 4.471500e-02 : f32
    %10 = vector.broadcast %cst_6 : f32 to vector<16x64xf32>
    %11 = arith.mulf %10, %9 : vector<16x64xf32>
    %12 = arith.addf %5, %11 : vector<16x64xf32>
    %cst_7 = arith.constant 0.797884583 : f32
    %13 = vector.broadcast %cst_7 : f32 to vector<16x64xf32>
    %14 = arith.mulf %13, %12 : vector<16x64xf32>
    %15 = math.tanh %14 : vector<16x64xf32>
    %cst_8 = arith.constant 1.000000e+00 : f32
    %16 = vector.broadcast %cst_8 : f32 to vector<16x64xf32>
    %17 = arith.addf %16, %15 : vector<16x64xf32>
    %18 = arith.mulf %7, %17 : vector<16x64xf32>
    %c0_9 = arith.constant 0 : index
    %c0_10 = arith.constant 0 : index
    %19 = vector.load %arg4[%c0_9, %c0_10] : memref<64x32xf32, #tpu.memory_space<vmem>>, vector<64x32xf32>
    %cst_11 = arith.constant dense<0.000000e+00> : vector<16x32xf32>
    %20 = tpu.matmul %18, %19, %cst_11 {dimension_numbers = #tpu.dot_dimension_numbers<[1], [0], [0], [1], [0, 0, 1, 1], [], []>} : vector<16x64xf32>, vector<64x32xf32>, vector<16x32xf32> -> vector<16x32xf32>
    %c0_12 = arith.constant 0 : index
    %c0_13 = arith.constant 0 : index
    %21 = vector.load %arg5[%c0_12, %c0_13] : memref<1x32xf32, #tpu.memory_space<vmem>>, vector<1x32xf32>
    %22 = vector.broadcast %21 : vector<1x32xf32> to vector<16x32xf32>
    %23 = arith.addf %20, %22 : vector<16x32xf32>
    %c0_14 = arith.constant 0 : index
    %c0_15 = arith.constant 0 : index
    %24 = vector.load %arg6[%c0_14, %c0_15] : memref<16x32xf32, #tpu.memory_space<vmem>>, vector<16x32xf32>
    tpu.vector_store %arg6[%c0_14, %c0_15], %23 {strides = array<i32>} : memref<16x32xf32, #tpu.memory_space<vmem>>, vector<16x32xf32>,
    return
  }
  func.func @transform_0(%arg0: i32) -> (i32, i32) {
    %c0_i32 = arith.constant 0 : i32
    %c0_i32_0 = arith.constant 0 : i32
    return %arg0, %c0_i32 : i32, i32
  }
  func.func @transform_1(%arg0: i32) -> (i32, i32) {
    %c0_i32 = arith.constant 0 : i32
    %c0_i32_0 = arith.constant 0 : i32
    %c0_i32_1 = arith.constant 0 : i32
    return %c0_i32, %c0_i32_0 : i32, i32
  }
  func.func @transform_2(%arg0: i32) -> (i32, i32) {
    %c0_i32 = arith.constant 0 : i32
    %c0_i32_0 = arith.constant 0 : i32
    %c0_i32_1 = arith.constant 0 : i32
    return %c0_i32, %c0_i32_0 : i32, i32
  }
  func.func @transform_3(%arg0: i32) -> (i32, i32) {
    %c0_i32 = arith.constant 0 : i32
    %c0_i32_0 = arith.constant 0 : i32
    %c0_i32_1 = arith.constant 0 : i32
    return %c0_i32, %c0_i32_0 : i32, i32
  }
  func.func @transform_4(%arg0: i32) -> (i32, i32) {
    %c0_i32 = arith.constant 0 : i32
    %c0_i32_0 = arith.constant 0 : i32
    %c0_i32_1 = arith.constant 0 : i32
    return %c0_i32, %c0_i32_0 : i32, i32
  }
  func.func @transform_5(%arg0: i32) -> (i32, i32) {
    %c0_i32 = arith.constant 0 : i32
    %c0_i32_0 = arith.constant 0 : i32
    return %arg0, %c0_i32 : i32, i32
  }
}

</mosaic_0001>

<bundles_post_ra>
// kernel: mlp_forward.1
= control target key start
LH: loop header
LB: loop body
LE: loop exit
PB: predicated region body
PF: predicated region fallthrough
CT: control target
= control target key end

     0   :  { %s280_s0 = inlined_call_operand.vmem [shape: f32[16,32], index: 0, kind: input, shape index: {}]   ;;  %s281_s1 = inlined_call_operand.vmem [shape: f32[32,64], index: 1, kind: input, shape index: {}]   ;;  %s282_s2 = inlined_call_operand.vmem [shape: f32[1,64], index: 2, kind: input, shape index: {}]   ;;  %s283_s3 = inlined_call_operand.vmem [shape: f32[64,32], index: 3, kind: input, shape index: {}]   ;;  %s284_s4 = inlined_call_operand.vmem [shape: f32[1,32], index: 4, kind: input, shape index: {}]   ;;  %s285_s5 = inlined_call_operand.hbm [shape: f32[16,32], index: 5, kind: output, shape index: {}]  }
   0x1   :  { %v26_v0 = vld [vmem:[%s281_s1 + $0x18] sm:$0xff]  ;;  %v25_v1 = vld [vmem:[%s281_s1 + $0x10] sm:$0xff]  ;;  %v24_v2 = vld [vmem:[%s281_s1 + $0x8] sm:$0xff] }
   0x2   :  { %50 = vmatpush.msra.mxu0 %v26_v0  ;;  %145 = vmatpush.msra.mxu3 %v26_v0 }
   0x4   :  { %51 = vmatpush.msra.mxu0 %v25_v1  ;;  %146 = vmatpush.msra.mxu3 %v25_v1 }
   0x5   :  { %10 = vsyncpa [#allocation3], 0  ;;  %v23_v3 = vld [vmem:[%s281_s1] sm:$0xff]  ;;  %vm31_vm0 = vcmask 261120   ;;  %v22_v5 = vld [vmem:[%s280_s0 + $0x8] sm:$0xff]  ;;  %vm91_vm1 = vcmask 523264  }
   0x6   :  { %52 = vmatpush.msra.mxu0 %v24_v2  ;;  %147 = vmatpush.msra.mxu3 %v24_v2  ;;  %v21_v4 = vld [vmem:[%s280_s0] sm:$0xff]  ;;  %v86_v6 = vld [vmem:[%s283_s3 + $0x38] sm:$0xff]  ;;  %v85_v7 = vld [vmem:[%s283_s3 + $0x30] sm:$0xff]  ;;  %s192_s21 = smov [#allocation2]   ;;  %s129_s25 = sshll.u32 %s285_s5, 4  ;;  %s130_s25 = int_to_ptr.hbm [resolvable:$true] %s129_s25 }
   0x7   :  { %106 = vmatpush.msra.mxu1 %v86_v6  ;;  %149 = vmatpush.msra.mxu2 %v86_v6  ;;  %v84_v8 = vld [vmem:[%s283_s3 + $0x28] sm:$0xff]  ;;  %v83_v9 = vld [vmem:[%s283_s3 + $0x20] sm:$0xff]  ;;  %v82_v10 = vld [vmem:[%s283_s3 + $0x18] sm:$0xff]  ;;  %s127_s22 = sshll.u32 %s192_s21, 4  ;;  %s193_s26 = smov 128   ;;  %s128_s22 = int_to_ptr.vmem [resolvable:$true] %s127_s22 }
   0x8   :  { %53 = vmatpush.msra.mxu0 %v23_v3  ;;  %148 = vmatpush.msra.mxu3 %v23_v3  ;;  %v81_v11 = vld [vmem:[%s283_s3 + $0x10] sm:$0xff]  ;;  %v80_v12 = vld [vmem:[%s283_s3 + $0x8] sm:$0xff]  ;;  %v79_v13 = vld [vmem:[%s283_s3] sm:$0xff]  ;;  %s194_s27 = smov 8  }
   0x9   :  { %141 = vmatmul.msk.f32.vlgmr.msra.gmra.mxu0 %vm31_vm0, %v21_v4  ;;  %142 = vmatmul.msk.f32.vlgmr.msra.gmra.mxu3 %vm31_vm0, %v22_v5  ;;  %v160_v14 = vld [vmem:[%s282_s2] ss:$0 sm:$0xff] }
   0xa   :  { %107 = vmatpush.msra.mxu1 %v85_v7  ;;  %150 = vmatpush.msra.mxu2 %v85_v7  ;;  %v161_v37 = vld [vmem:[%s284_s4] ss:$0 sm:$0xff] }
   0xc   :  { %108 = vmatpush.msra.mxu1 %v84_v8  ;;  %151 = vmatpush.msra.mxu2 %v84_v8 }
   0xe   :  { %109 = vmatpush.msra.mxu1 %v83_v9  ;;  %152 = vmatpush.msra.mxu2 %v83_v9 }
  0x10   :  { %110 = vmatpush.msra.mxu1 %v82_v10  ;;  %153 = vmatpush.msra.mxu2 %v82_v10 }
  0x12   :  { %111 = vmatpush.msra.mxu1 %v81_v11  ;;  %154 = vmatpush.msra.mxu2 %v81_v11 }
  0x14   :  { %112 = vmatpush.msra.mxu1 %v80_v12  ;;  %155 = vmatpush.msra.mxu2 %v80_v12 }
  0x16   :  { %113 = vmatpush.msra.mxu1 %v79_v13  ;;  %156 = vmatpush.msra.mxu2 %v79_v13 }
  0x86   :  { %v55_v15 = vpop.f32.mrf.mxu0 }
  0x87   :  { %v56_v16 = vadd.f32 %v160_v14, %v55_v15 }
  0x89   :  { %v63_v17 = vmul.f32 %v56_v16, %v56_v16  ;;  %v61_v30 = vmul.f32 0.5, %v56_v16 }
  0x8b   :  { %v65_v18 = vmul.f32 %v63_v17, %v56_v16 }
  0x8c   :  { %v58_v19 = vpop.f32.mrf.mxu3 }
  0x8d   :  { %v67_v20 = vmul.f32 0.044715, %v65_v18  ;;  %v59_v21 = vadd.f32 %v160_v14, %v58_v19 }
  0x8f   :  { %v69_v22 = vadd.f32 %v67_v20, %v56_v16  ;;  %v64_v23 = vmul.f32 %v59_v21, %v59_v21  ;;  %v62_v34 = vmul.f32 0.5, %v59_v21 }
  0x91   :  { %v66_v24 = vmul.f32 %v64_v23, %v59_v21  ;;  %v71_v25 = vmul.f32 0.7978846, %v69_v22 }
  0x93   :  { %v68_v26 = vmul.f32 0.044715, %v66_v24  ;;  %162 = vtanh.f32 %v71_v25 }
  0x95   :  { %v70_v27 = vadd.f32 %v68_v26, %v59_v21 }
  0x97   :  { %v72_v28 = vmul.f32 0.7978846, %v70_v27 }
  0x99   :  { %v163_v29 = vpop.eup %162  ;;  %164 = vtanh.f32 %v72_v28 }
  0x9a   :  { %v75_v31 = vadd.f32 1.0, %v163_v29 }
  0x9c   :  { %v77_v32 = vmul.f32 %v75_v31, %v61_v30 }
  0x9e   :  { %143 = vmatmul.msk.f32.vlgmr.msra.gmra.mxu1 %vm91_vm1, %v77_v32 }
  0x9f   :  { %v165_v33 = vpop.eup %164 }
  0xa0   :  { %v76_v35 = vadd.f32 1.0, %v165_v33 }
  0xa2   :  { %v78_v36 = vmul.f32 %v76_v35, %v62_v34 }
  0xa4   :  { %144 = vmatmul.msk.f32.vlgmr.msra.gmra.mxu2 %vm91_vm1, %v78_v36 }
 0x11b   :  { %v115_v38 = vpop.f32.mrf.mxu1 }
 0x11c   :  { %v116_v39 = vadd.f32 %v161_v37, %v115_v38 }
 0x11e   :  { %121 = vst.msk [vmem:[#allocation2] sm:$0xff] %vm31_vm0, %v116_v39 }
 0x127   :  { %v118_v40 = vpop.f32.mrf.mxu2 }
 0x128   :  { %v119_v41 = vadd.f32 %v161_v37, %v118_v40 }
 0x12a   :  { %122 = vst.msk [vmem:[#allocation2 + $0x8] sm:$0xff] %vm31_vm0, %v119_v41 }
 0x12b   :  { %135 = dma.vmem_to_hbm [thread:$0]  %s128_s22, 256, %s130_s25, [#allocation3], %s193_s26, %s193_s26, %s194_s27  }
 0x12c   :  { %190 = dma.done.wait [#allocation3], 256  }
 0x12d   :  { %191 = vsyncadd [#allocation3], 4294967040 }
 0x12e   :  { %140 = vsyncpa [#allocation3], 1 }

</bundles_post_ra>
